<compile_context>
chip_gen: v7x
topology: tpu7x:2x2x1
jax: 0.10.0
libtpu: 0.0.40
codegen_flags: <defaults>
</compile_context>

<pallas_src>
import jax
import jax.numpy as jnp
from jax.experimental import pallas as pl
from jax.experimental.pallas import tpu as pltpu


_LANES = 128
_SUBLANES = 8
_LW = 512                              # lane width of the folded narrow-C layout
_MAX_TILE_BYTES = 8 * 1024 * 1024      # per-step streaming budget (x2 double-buffer)
_MAX_TILE_ROWS = 4096                  # keeps padded (TN,1) sides small on v7x VMEM


def _cdiv(a, b):
    return -(-a // b)


def _round_up(x, m):
    return _cdiv(x, m) * m


# --------------------------------------------------------------------------
# Wide-C kernel (C >= 128): pick pred[i, target_i] per row with compare+select.
# --------------------------------------------------------------------------
def _row_pick_kernel(tgt_ref, coef_ref, pred_ref, num_ref):
    i = pl.program_id(1)                       # inner (reduction) axis

    @pl.when(i == 0)
    def _init():
        num_ref[...] = jnp.zeros_like(num_ref)

    pred = pred_ref[...]                       # (TN, C), input dtype (f32 / bf16)
    tgt = tgt_ref[...]                         # (TN, 1) int32
    coef = coef_ref[...]                       # (TN, 1) f32 (= weight[t] * mask)

    tn, c = pred.shape
    col = jax.lax.broadcasted_iota(jnp.int32, (tn, c), 1)
    # Select + lane-reduce in the input dtype (exact: one nonzero per row, rest
    # are true zeros); upcast only the (TN,1) result -> halves vreg/VALU traffic
    # on the dominant (TN,C) stage for bf16 inputs.
    picked = jnp.sum(jnp.where(col == tgt, pred, jnp.zeros_like(pred)),
                     axis=1, keepdims=True).astype(jnp.float32)       # (TN, 1)
    partial = jnp.sum(picked * coef)                                  # f32 scalar
    num_ref[...] += -partial                   # broadcast into the (1,128) block


# --------------------------------------------------------------------------
# Narrow-C kernel (C < 128): lane-dense multiply+reduce of pred against a
# one-hot * coef selection stream built in the wrapper.
# --------------------------------------------------------------------------
def _sel_dot_kernel(pred_ref, sel_ref, num_ref):
    i = pl.program_id(1)

    @pl.when(i == 0)
    def _init():
        num_ref[...] = jnp.zeros_like(num_ref)

    prod = pred_ref[...].astype(jnp.float32) * sel_ref[...]           # (TR, 512)
    num_ref[...] += -jnp.sum(prod)


def _numer_wide(pred, target, coef, tile_rows):
    """C >= 128: per-row selection kernel. Returns the f32 numerator sum."""
    n, c = pred.shape
    itemsize = jnp.dtype(pred.dtype).itemsize

    if tile_rows is not None:
        tn = max(_SUBLANES, _round_up(int(tile_rows), _SUBLANES))
    else:
        tn = _MAX_TILE_BYTES // max(1, c * itemsize)
        tn = max(_SUBLANES, (tn // _SUBLANES) * _SUBLANES)
    half = max(1, _cdiv(n, 2))                 # rows per TensorCore slice
    tn = min(tn, _MAX_TILE_ROWS, _round_up(half, _SUBLANES))
    tn = max(tn, _SUBLANES)

    tiles_per_half = _cdiv(half, tn)
    n_pad = 2 * tiles_per_half * tn
    if n_pad != n:
        # Padded rows: coef = 0 and pred = 0 -> contribute nothing.
        pad = n_pad - n
        pred = jnp.pad(pred, ((0, pad), (0, 0)))
        target = jnp.pad(target, (0, pad))
        coef = jnp.pad(coef, (0, pad))

    tgt2 = target.astype(jnp.int32).reshape(n_pad, 1)
    coef2 = coef.astype(jnp.float32).reshape(n_pad, 1)

    pred_tile = tn * c * itemsize
    side_tile = tn * _LANES * 4                # (TN,1) pads to 128 lanes in VMEM
    vmem_bytes = 2 * (pred_tile + 2 * side_tile) + 4 * 1024 * 1024
    vmem_bytes = int(min(max(vmem_bytes, 16 * 1024 * 1024), 48 * 1024 * 1024))

    out = pl.pallas_call(
        _row_pick_kernel,
        out_shape=jax.ShapeDtypeStruct((1, 2 * _LANES), jnp.float32),
        grid=(2, tiles_per_half),
        in_specs=[
            pl.BlockSpec((tn, 1), lambda p, i: (p * tiles_per_half + i, 0)),
            pl.BlockSpec((tn, 1), lambda p, i: (p * tiles_per_half + i, 0)),
            pl.BlockSpec((tn, c), lambda p, i: (p * tiles_per_half + i, 0)),
        ],
        out_specs=pl.BlockSpec((1, _LANES), lambda p, i: (0, p)),
        compiler_params=pltpu.CompilerParams(
            dimension_semantics=("parallel", "arbitrary"),
            vmem_limit_bytes=vmem_bytes,
        ),
        cost_estimate=pl.CostEstimate(
            flops=3 * n_pad * c,
            transcendentals=0,
            bytes_accessed=n_pad * c * itemsize + n_pad * 8 + 2 * _LANES * 4,
        ),
    )(tgt2, coef2, pred)
    # Per-core partial sums live in lane 0 of each (1,128) block.
    return out[0, 0] + out[0, _LANES]


def _numer_narrow(pred, target, coef, tile_rows):
    """C < 128: lane-dense folded layout. Returns the f32 numerator sum."""
    n, c = pred.shape
    itemsize = jnp.dtype(pred.dtype).itemsize

    # One-hot * coef selection stream (single XLA compare/select pass).
    col = jax.lax.broadcasted_iota(jnp.int32, (n, c), 1)
    sel = jnp.where(col == target.reshape(n, 1), coef.reshape(n, 1),
                    jnp.float32(0.0)).astype(jnp.float32)

    total = n * c
    rows = max(1, _cdiv(total, _LW))
    half = max(1, _cdiv(rows, 2))

    if tile_rows is not None:
        tr = max(_SUBLANES, _round_up(int(tile_rows), _SUBLANES))
    else:
        tr = _MAX_TILE_BYTES // (_LW * (itemsize + 4))   # pred + f32 sel per step
        tr = max(_SUBLANES, (tr // _SUBLANES) * _SUBLANES)
    tr = min(tr, _MAX_TILE_ROWS, _round_up(half, _SUBLANES))
    tr = max(tr, _SUBLANES)

    tiles_per_half = _cdiv(half, tr)
    rows_pad = 2 * tiles_per_half * tr
    flat_len = rows_pad * _LW

    pred_flat = jnp.pad(pred.reshape(total), (0, flat_len - total)
                        ).reshape(rows_pad, _LW)
    sel_flat = jnp.pad(sel.reshape(total), (0, flat_len - total)
                       ).reshape(rows_pad, _LW)

    tile_bytes = tr * _LW * (itemsize + 4)
    vmem_bytes = 2 * tile_bytes + 4 * 1024 * 1024
    vmem_bytes = int(min(max(vmem_bytes, 16 * 1024 * 1024), 48 * 1024 * 1024))

    out = pl.pallas_call(
        _sel_dot_kernel,
        out_shape=jax.ShapeDtypeStruct((1, 2 * _LANES), jnp.float32),
        grid=(2, tiles_per_half),
        in_specs=[
            pl.BlockSpec((tr, _LW), lambda p, i: (p * tiles_per_half + i, 0)),
            pl.BlockSpec((tr, _LW), lambda p, i: (p * tiles_per_half + i, 0)),
        ],
        out_specs=pl.BlockSpec((1, _LANES), lambda p, i: (0, p)),
        compiler_params=pltpu.CompilerParams(
            dimension_semantics=("parallel", "arbitrary"),
            vmem_limit_bytes=vmem_bytes,
        ),
        cost_estimate=pl.CostEstimate(
            flops=2 * flat_len,
            transcendentals=0,
            bytes_accessed=flat_len * (itemsize + 4) + 2 * _LANES * 4,
        ),
    )(pred_flat, sel_flat)
    return out[0, 0] + out[0, _LANES]


def masked_loss(pred, target, mask=None, weight=None, tile_rows=None):
    """JAX/Pallas equivalent of MaskedLoss.forward. pred: (N, C) log-probs."""
    n, c = pred.shape
    target = target.astype(jnp.int32).reshape(n)
    has_mask = mask is not None
    has_weight = weight is not None

    # coef_i = weight[target_i] * mask_i, missing factors treated as 1.
    if has_weight:
        coef = weight.astype(jnp.float32)[target]
    else:
        coef = jnp.ones((n,), jnp.float32)
    if has_mask:
        coef = coef * mask.astype(jnp.float32).reshape(n)

    # Denominator pieces are a tiny N-element XLA reduce (kernel keeps a single
    # accumulator output).
    csum = jnp.sum(coef)

    if c >= _LANES:
        numer = _numer_wide(pred, target, coef, tile_rows)
    else:
        numer = _numer_narrow(pred, target, coef, tile_rows)

    if has_mask and not has_weight:
        # csum == sum(mask); guard the zero case exactly like the module.
        denom = jnp.where(csum != 0, csum, jnp.float32(0.001))
        return numer / denom
    if has_weight:
        # With mask: csum = sum(weight[target]*mask) (0/0 -> NaN, matches torch);
        # without: csum = sum(weight[target]).
        return numer / csum
    return numer


def _reference(pred, target, mask=None, weight=None):
    """Pure-JAX reference mirroring the PyTorch module."""
    n, c = pred.shape
    w = weight if weight is not None else jnp.ones((c,), jnp.float32)
    w_t = w[target]
    picked = pred[jnp.arange(n), target]
    if mask is not None:
        numer = -jnp.sum(w_t * mask * picked)
        if weight is None:
            denom = jnp.where(jnp.sum(mask) != 0, jnp.sum(mask), 0.001)
            return numer / denom
        return numer / jnp.sum(w_t * mask)
    numer = -jnp.sum(w_t * picked)
    if weight is None:
        return numer
    return numer / jnp.sum(w_t)


if __name__ == "__main__":
    key = jax.random.PRNGKey(0)
    k = jax.random.split(key, 16)

    cases = []

    # --- Narrow-C path (C < 128): N=16, C=10 --------------------------------
    N, C = 16, 10
    pred = jax.nn.log_softmax(jax.random.normal(k[0], (N, C), jnp.float32), -1)
    target = jax.random.randint(k[1], (N,), 0, C, jnp.int32)
    mask = (jax.random.uniform(k[2], (N,)) > 0.3).astype(jnp.float32)
    weight = jax.random.uniform(k[3], (C,), jnp.float32, 0.5, 1.5)

    cases += [
        (masked_loss(pred, target, mask=mask),
         _reference(pred, target, mask=mask)),
        (masked_loss(pred, target, mask=mask, weight=weight),
         _reference(pred, target, mask=mask, weight=weight)),
        (masked_loss(pred, target),
         _reference(pred, target)),
        (masked_loss(pred, target, weight=weight),
         _reference(pred, target, weight=weight)),
    ]

    # bf16 pred passthrough on the narrow path.
    pred_bf16 = pred.astype(jnp.bfloat16)
    cases.append((masked_loss(pred_bf16, target, mask=mask, weight=weight),
                  _reference(pred_bf16.astype(jnp.float32), target,
                             mask=mask, weight=weight)))

    # Ragged N + explicit small tile (forces padding; tile_rows rounded to 8).
    N2, C2 = 43, 24
    pred2 = jax.nn.log_softmax(jax.random.normal(k[4], (N2, C2), jnp.float32), -1)
    target2 = jax.random.randint(k[5], (N2,), 0, C2, jnp.int32)
    mask2 = (jax.random.uniform(k[6], (N2,)) > 0.4).astype(jnp.float32)
    cases.append((masked_loss(pred2, target2, mask=mask2, tile_rows=8),
                  _reference(pred2, target2, mask=mask2)))

    # Narrow path with a multi-tile inner grid (accumulation across tiles).
    N3, C3 = 400, 24
    pred3 = jax.nn.log_softmax(jax.random.normal(k[7], (N3, C3), jnp.float32), -1)
    target3 = jax.random.randint(k[8], (N3,), 0, C3, jnp.int32)
    mask3 = (jax.random.uniform(k[9], (N3,)) > 0.5).astype(jnp.float32)
    weight3 = jax.random.uniform(k[10], (C3,), jnp.float32, 0.5, 1.5)
    cases.append((masked_loss(pred3, target3, mask=mask3, weight=weight3,
                              tile_rows=8),
                  _reference(pred3, target3, mask=mask3, weight=weight3)))

    # --- Wide-C path (C >= 128): N=40, C=160 --------------------------------
    N4, C4 = 40, 160
    pred4 = jax.nn.log_softmax(jax.random.normal(k[11], (N4, C4), jnp.float32), -1)
    target4 = jax.random.randint(k[12], (N4,), 0, C4, jnp.int32)
    mask4 = (jax.random.uniform(k[13], (N4,)) > 0.4).astype(jnp.float32)
    weight4 = jax.random.uniform(k[14], (C4,), jnp.float32, 0.5, 1.5)
    pred4_bf16 = pred4.astype(jnp.bfloat16)

    cases += [
        (masked_loss(pred4, target4, mask=mask4, weight=weight4),
         _reference(pred4, target4, mask=mask4, weight=weight4)),
        (masked_loss(pred4, target4, mask=mask4, tile_rows=8),      # multi-tile
         _reference(pred4, target4, mask=mask4)),
        (masked_loss(pred4_bf16, target4, weight=weight4),          # bf16 wide
         _reference(pred4_bf16.astype(jnp.float32), target4, weight=weight4)),
    ]

    for got, want in cases:
        got = jax.block_until_ready(got)
        assert jnp.allclose(got, want, rtol=1e-5, atol=1e-5), (got, want)

    print("KERNEL_OK")
</pallas_src>

<mosaic_0001>
module attributes {stable_mosaic.version = 11 : i64} {
  func.func @_sel_dot_kernel(%arg0: i32, %arg1: i32, %arg2: memref<8x512xf32, #tpu.memory_space<vmem>>, %arg3: memref<8x512xf32, #tpu.memory_space<vmem>>, %arg4: memref<1x128xf32, #tpu.memory_space<vmem>>) attributes {dimension_semantics = [#tpu.dimension_semantics<parallel>, #tpu.dimension_semantics<arbitrary>], iteration_bounds = array<i64: 2, 1>, scalar_prefetch = 0 : i64, scratch_operands = 0 : i64, tpu.core_type = #tpu.core_type<tc>, window_params = [{transform_indices = @transform_0, window_bounds = array<i64: 8, 512>}, {transform_indices = @transform_1, window_bounds = array<i64: 8, 512>}, {transform_indices = @transform_2, window_bounds = array<i64: 1, 128>}]} {
    %c0_i32 = arith.constant 0 : i32
    %0 = arith.cmpi eq, %arg1, %c0_i32 : i32
    %1 = arith.extui %0 : i1 to i32
    %c0_i32_0 = arith.constant 0 : i32
    %2 = arith.cmpi ne, %1, %c0_i32_0 : i32
    scf.if %2 {
      %cst_9 = arith.constant 0.000000e+00 : f32
      %15 = vector.broadcast %cst_9 : f32 to vector<1x128xf32>
      %c0_10 = arith.constant 0 : index
      %c0_11 = arith.constant 0 : index
      %16 = vector.load %arg4[%c0_10, %c0_11] : memref<1x128xf32, #tpu.memory_space<vmem>>, vector<1x128xf32>
      tpu.vector_store %arg4[%c0_10, %c0_11], %15 {strides = array<i32>} : memref<1x128xf32, #tpu.memory_space<vmem>>, vector<1x128xf32>,
    } else {
    }
    %c0 = arith.constant 0 : index
    %c0_1 = arith.constant 0 : index
    %3 = vector.load %arg2[%c0, %c0_1] : memref<8x512xf32, #tpu.memory_space<vmem>>, vector<8x512xf32>
    %c0_2 = arith.constant 0 : index
    %c0_3 = arith.constant 0 : index
    %4 = vector.load %arg3[%c0_2, %c0_3] : memref<8x512xf32, #tpu.memory_space<vmem>>, vector<8x512xf32>
    %5 = arith.mulf %3, %4 : vector<8x512xf32>
    %c0_4 = arith.constant 0 : index
    %c0_5 = arith.constant 0 : index
    %6 = vector.load %arg4[%c0_4, %c0_5] : memref<1x128xf32, #tpu.memory_space<vmem>>, vector<1x128xf32>
    %7 = vector.shape_cast %5 : vector<8x512xf32> to vector<1x8x512xf32>
    %cst = arith.constant dense<0.000000e+00> : vector<1xf32>
    %8 = vector.multi_reduction <add>, %7, %cst [1, 2] : vector<1x8x512xf32> to vector<1xf32>
    %9 = vector.shape_cast %8 : vector<1xf32> to vector<1x1x1xf32>
    %10 = vector.extract %9[0, 0, 0] : f32 from vector<1x1x1xf32>
    %cst_6 = arith.constant 0.000000e+00 : f32
    %11 = arith.subf %cst_6, %10 : f32
    %12 = vector.broadcast %11 : f32 to vector<1x128xf32>
    %13 = arith.addf %6, %12 : vector<1x128xf32>
    %c0_7 = arith.constant 0 : index
    %c0_8 = arith.constant 0 : index
    %14 = vector.load %arg4[%c0_7, %c0_8] : memref<1x128xf32, #tpu.memory_space<vmem>>, vector<1x128xf32>
    tpu.vector_store %arg4[%c0_7, %c0_8], %13 {strides = array<i32>} : memref<1x128xf32, #tpu.memory_space<vmem>>, vector<1x128xf32>,
    return
  }
  func.func @transform_0(%arg0: i32, %arg1: i32) -> (i32, i32) {
    %c1_i32 = arith.constant 1 : i32
    %0 = arith.muli %arg0, %c1_i32 : i32
    %1 = arith.addi %0, %arg1 : i32
    %c0_i32 = arith.constant 0 : i32
    %c0_i32_0 = arith.constant 0 : i32
    return %1, %c0_i32 : i32, i32
  }
  func.func @transform_1(%arg0: i32, %arg1: i32) -> (i32, i32) {
    %c1_i32 = arith.constant 1 : i32
    %0 = arith.muli %arg0, %c1_i32 : i32
    %1 = arith.addi %0, %arg1 : i32
    %c0_i32 = arith.constant 0 : i32
    %c0_i32_0 = arith.constant 0 : i32
    return %1, %c0_i32 : i32, i32
  }
  func.func @transform_2(%arg0: i32, %arg1: i32) -> (i32, i32) {
    %c0_i32 = arith.constant 0 : i32
    %c0_i32_0 = arith.constant 0 : i32
    return %c0_i32, %arg0 : i32, i32
  }
}

</mosaic_0001>

<bundles_post_ra>
// kernel: tpu_custom_call.1
= control target key start
LH: loop header
LB: loop body
LE: loop exit
PB: predicated region body
PF: predicated region fallthrough
CT: control target
= control target key end

     0   :  { %7 = vsyncpa [#allocation3], 0  ;;  %s839_s0 = inlined_call_operand.hbm [shape: f32[16,512], index: 0, kind: input, shape index: {}]   ;;  %s840_s1 = inlined_call_operand.hbm [shape: f32[16,512], index: 1, kind: input, shape index: {}]   ;;  %s841_s2 = inlined_call_operand.hbm [shape: f32[1,256], index: 2, kind: output, shape index: {}]  }
   0x1   :  { %9 = vsyncpa [#allocation3 + $0x1], 0 }
   0x2   :  { %10 = vsyncpa [#allocation6], 0 }
   0x3   :  { %12 = vsyncpa [#allocation6 + $0x1], 0 }
   0x4   :  { %13 = vsyncpa [#allocation4], 0 }
   0x5   :  { %15 = vsyncpa [#allocation4 + $0x1], 0  ;;  %s618_s9 = smov 0   ;;  %s620_s10 = smov 0  }
   0x6   :  { %s622_s11 = smov 0   ;;  %s624_s12 = smov 0  }
   0x7   :  { %s626_s13 = smov 0   ;;  %s628_s14 = smov 0  }
   0x8 LB: > { %s363_s15 = sadd.s32 4294967295, %s597_s14   ;;  %s364_s16 = sadd.s32 4294967294, %s597_s14   ;;  %s597_s14 = sphi %s628_s14, %s21_s14   ;;  %s593_s13 = sphi %s626_s13, %s861_s13   ;;  %s589_s12 = sphi %s624_s12, %s860_s12   ;;  %s585_s11 = sphi %s622_s11, %s859_s11   ;;  %s581_s10 = sphi %s620_s10, %s858_s10   ;;  %s577_s9 = sphi %s618_s9, %s857_s9  }
   0x9   : > { %s33_s17 = sadd.s32 1, %s593_s13  ;;  %s42_s18 = sadd.s32 1, %s585_s11 }
   0xa   : > { %p35_p0 = scmp.ge.s32.totalorder %s33_s17, 2  ;;  %p49_p1 = scmp.ne.s32.totalorder %s585_s11, %s581_s10 }
   0xb   : > { %p50_p2 = scmp.eq.s32.totalorder %s597_s14, 0  ;;  %p55_p3 = scmp.ne.s32.totalorder %s581_s10, %s577_s9 }
   0xc   : > { %s863_s17 = smov (%p35_p0, %s33_s17), 0  ;;  %p56_p5 = scmp.eq.s32.totalorder %s363_s15, 0 }
   0xd   : > { %p659_p4 = por %p50_p2, %p49_p1  ;;  %s39_s20 = ssub.s32 %s593_s13, %s863_s17 }
   0xe   : > { %p107_p6 = scmp.eq.s32.totalorder %s363_s15, 1  ;;  %p40_p7 = scmp.eq.s32.totalorder %s39_s20, 0 }
   0xf   : > { %p665_p8 = por %p56_p5, %p55_p3  ;;  %p113_p10 = scmp.eq.s32.totalorder %s364_s16, 1 }
  0x10   : > { %p669_p9 = por %p107_p6, %p49_p1  ;;  %p400_p13 = scmp.lt.s32.totalorder %s597_s14, 2 }
  0x11   : > { %s845_s21 = scalar_select %p665_p8, 1, 0 }
  0x12   : > { %s846_s22 = scalar_select %p669_p9, 1, 0 }
  0x13   : > { %s674_s23 = scalar_select %p40_p7, %s585_s11, %s42_s18  }
  0x14   : > { %p676_p11 = por %p113_p10, %p55_p3  ;;  %s683_s25 = sand.u32 1, %s585_s11  }
  0x15   : > { %s367_s26 = sshll.u32 %s683_s25, 5  ;;  %s379_s27 = sshll.u32 %s593_s13, 9 }
  0x16   : > { %s847_s24 = scalar_select %p676_p11, 1, 0 }
  0x17   : > { %s692_s30 = scalar_lea.hbm %s839_s0, %s379_s27  ;;  %s137_s3 = scalar_lea.vmem [#allocation2], %s367_s26 }
  0x18   : > { %s146_s4 = sshll.u32 %s137_s3, 4  ;;  %p700_p0 = pnand %p400_p13, %p659_p4  ;;  %s696_s4 = int_to_ptr.vmem [resolvable:$true] %s146_s4 }
  0x19   : > { %s134_s6 = scalar_lea.sflag [#allocation3], %s683_s25  ;;  %s451_s7 = scalar_lea.hbm %s692_s30, 512 }
  0x1a   : > { %p452_p3 = scmp.ne.s32.totalorder %s692_s30, %s451_s7  ;;  %p453_p5 = pneg %p700_p0 }
  0x1b   : > { %s456_s16 = scalar_lea.hbm %s839_s0, 1024  ;;  %p457_p4 = scmp.lt.u32.totalorder %s692_s30, %s839_s0 }
  0x1c   : > { %p454_p6 = pnand %p453_p5, %p452_p3  ;;  %p458_p10 = scmp.lt.u32.totalorder %s456_s16, %s451_s7 }
  0x1d   : > { %p460_p12 = scmp.lt.u32.totalorder %s451_s7, %s692_s30 }
  0x1e   : > { %p455_p7 = pneg %p454_p6  ;;  %p459_p13 = por %p458_p10, %p457_p4 }
  0x20   : > { %p461_p1 = por %p460_p12, %p459_p13 }
  0x22   : > { %p462_p2 = pnand %p461_p1, %p455_p7 }
  0x24   : > { %465 = shalt.err (!%p462_p2)
}
  0x25   : > { %s466_s20 = scalar_lea.vmem %s696_s4, 512  ;;  %s599_s28 = smov [#allocation2]  }
  0x26   : > { %p467_p3 = scmp.ne.s32.totalorder %s696_s4, %s466_s20  ;;  %s471_s29 = sshll.u32 %s599_s28, 4  ;;  %s472_s29 = int_to_ptr.vmem [resolvable:$false] %s471_s29 }
  0x27   : > { %s473_s3 = scalar_lea.vmem %s472_s29, 1024  ;;  %p474_p9 = scmp.lt.s32.totalorder %s696_s4, %s472_s29 }
  0x28   : > { %p469_p6 = pnand %p467_p3, %p453_p5  ;;  %p475_p4 = scmp.lt.s32.totalorder %s473_s3, %s466_s20 }
  0x2a   : > { %p470_p11 = pneg %p469_p6  ;;  %p476_p10 = por %p475_p4, %p474_p9 }
  0x2c   : > { %p477_p12 = pnand %p476_p10, %p470_p11 }
  0x2e   : > { %480 = shalt.err (!%p477_p12)
}
  0x2f   : > { %392 = dma.hbm_to_vmem [thread:$0]  (!%p700_p0), %s692_s30, 512, %s696_s4, %s134_s6  }
  0x30   : > { %p849_p1 = scmp.lt.s32.totalorder %s597_s14, 3  ;;  %p850_p2 = scmp.ge.s32.totalorder %s597_s14, 1 }
  0x31   : > { %s745_s16 = scalar_lea.hbm %s840_s1, %s379_s27  ;;  %s157_s18 = scalar_lea.vmem [#allocation5], %s367_s26 }
  0x32   : > { %p736_p7 = pnand %p850_p2, %p849_p1  ;;  %s166_s19 = sshll.u32 %s157_s18, 4  ;;  %s167_s19 = int_to_ptr.vmem [resolvable:$true] %s166_s19 }
  0x33   : > { %s154_s30 = scalar_lea.sflag [#allocation6], %s683_s25  ;;  %s481_s4 = scalar_lea.hbm %s745_s16, 512 }
  0x34   : > { %s851_s7 = scalar_select %p736_p7, 1, 0 }
  0x35   : > { %p482_p9 = scmp.ne.s32.totalorder %s745_s16, %s481_s4  ;;  %s486_s27 = scalar_lea.hbm %s840_s1, 1024 }
  0x36   : > { %p487_p3 = scmp.lt.u32.totalorder %s745_s16, %s840_s1  ;;  %p488_p6 = scmp.lt.u32.totalorder %s486_s27, %s481_s4 }
  0x37   : > { %p484_p11 = pnand %p482_p9, %p453_p5  ;;  %p490_p10 = scmp.lt.u32.totalorder %s481_s4, %s745_s16 }
  0x38   : > { %p489_p4 = por %p488_p6, %p487_p3 }
  0x39   : > { %p485_p13 = pneg %p484_p11 }
  0x3a   : > { %p491_p12 = por %p490_p10, %p489_p4 }
  0x3c   : > { %p492_p1 = pnand %p491_p12, %p485_p13 }
  0x3e   : > { %495 = shalt.err (!%p492_p1)
}
  0x3f   : > { %s496_s25 = scalar_lea.vmem %s167_s19, 512  ;;  %s600_s26 = smov [#allocation5]  }
  0x40   : > { %p497_p2 = scmp.ne.s32.totalorder %s167_s19, %s496_s25  ;;  %s501_s3 = sshll.u32 %s600_s26, 4  ;;  %s502_s3 = int_to_ptr.vmem [resolvable:$false] %s501_s3 }
  0x41   : > { %s503_s8 = scalar_lea.vmem %s502_s3, 1024  ;;  %p504_p8 = scmp.lt.s32.totalorder %s167_s19, %s502_s3 }
  0x42   : > { %p499_p9 = pnand %p497_p2, %p453_p5  ;;  %p505_p7 = scmp.lt.s32.totalorder %s503_s8, %s496_s25 }
  0x44   : > { %p500_p11 = pneg %p499_p9  ;;  %p506_p3 = por %p505_p7, %p504_p8 }
  0x46   : > { %p507_p6 = pnand %p506_p3, %p500_p11 }
  0x48   : > { %510 = shalt.err (!%p507_p6)
}
  0x49   : > { %395 = dma.hbm_to_vmem [thread:$0]  (!%p700_p0), %s745_s16, 512, %s167_s19, %s154_s30  }
  0x4a   : > { %p852_p13 = scmp.ne.s32.totalorder %s851_s7, 0 }
  0x4b   : > { %s772_s15 = sand.u32 (!%p852_p13), 1, %s581_s10   ;;  %p853_p5 = scmp.ne.s32.totalorder (!%p852_p13), %s845_s21, 0 }
  0x4c   : > { %175 = sbr.rel (%p852_p13) target bundleno = 320 (0x140), region = 28  ;;  %s374_s18 = sshll.u32 (!%p852_p13), %s772_s15, 5 }
  0x4d   : > { %s178_s4 = scalar_lea.sflag (!%p852_p13), [#allocation3], %s772_s15  ;;  %s181_s6 = scalar_lea.vmem (!%p852_p13), [#allocation2], %s374_s18 }
  0x53   : > { %564 = dma.done.wait (%p853_p5), %s178_s4, 512  }
  0x54   : > { %566 = vsyncadd (%p853_p5), %s178_s4, 4294966784  ;;  %s187_s5 = scalar_lea.sflag [#allocation6], %s772_s15  ;;  %s190_s16 = scalar_lea.vmem [#allocation5], %s374_s18 }
  0x55   : > { %568 = dma.done.wait (%p853_p5), %s187_s5, 512  }
  0x56   : > { %570 = vsyncadd (%p853_p5), %s187_s5, 4294966784  ;;  %v222_v0 = vld [vmem:[%s181_s6] sm:$0xff]  ;;  %v223_v1 = vld [vmem:[%s181_s6 + $0x8] sm:$0xff]  ;;  %s214_s21 = scalar_lea.vmem [#allocation7], %s772_s15  ;;  %v601_v15 = vmov 0.0   ;;  %s376_s19 = sshll.u32 %s589_s12, 4 }
  0x57   : > { %v224_v2 = vld [vmem:[%s181_s6 + $0x10] sm:$0xff]  ;;  %v225_v3 = vld [vmem:[%s181_s6 + $0x18] sm:$0xff]  ;;  %v226_v4 = vld [vmem:[%s190_s16] sm:$0xff]  ;;  %221 = vst [vmem:[%s214_s21] sm:$0x1] %v601_v15  ;;  %s264_s20 = sshll.u32 %s214_s21, 4  ;;  %s790_s29 = scalar_lea.hbm %s841_s2, %s376_s19  ;;  %s792_s20 = int_to_ptr.vmem [resolvable:$true] %s264_s20 }
  0x58   : > { %v227_v5 = vld [vmem:[%s190_s16 + $0x8] sm:$0xff]  ;;  %v228_v6 = vld [vmem:[%s190_s16 + $0x10] sm:$0xff]  ;;  %v229_v7 = vld [vmem:[%s190_s16 + $0x18] sm:$0xff]  ;;  %v230_v8 = vmul.f32 %v226_v4, %v222_v0  ;;  %s252_s25 = scalar_lea.sflag [#allocation4], %s772_s15  ;;  %s511_s26 = scalar_lea.vmem %s792_s20, 16 }
  0x59   : > { %v231_v9 = vmul.f32 %v227_v5, %v223_v1  ;;  %v232_v10 = vmul.f32 %v228_v6, %v224_v2  ;;  %v233_v11 = vmul.f32 %v229_v7, %v225_v3  ;;  %p512_p8 = scmp.ne.s32.totalorder %s792_s20, %s511_s26  ;;  %p854_p0 = scmp.ne.s32.totalorder %s846_s22, 0 }
  0x5a   : > { %s602_s12 = smov [#allocation7]  }
  0x5b   : > { %v235_v12 = vadd.f32 %v231_v9, %v230_v8  ;;  %p513_p7 = pnand %p512_p8, %p854_p0  ;;  %s515_s3 = sshll.u32 %s602_s12, 4  ;;  %s516_s3 = int_to_ptr.vmem [resolvable:$false] %s515_s3 }
  0x5c   : > { %s517_s8 = scalar_lea.vmem %s516_s3, 32  ;;  %p518_p10 = scmp.lt.s32.totalorder %s792_s20, %s516_s3 }
  0x5d   : > { %v236_v13 = vadd.f32 %v235_v12, %v232_v10  ;;  %p514_p4 = pneg %p513_p7  ;;  %p519_p12 = scmp.lt.s32.totalorder %s517_s8, %s511_s26 }
  0x5e   : > { %v234_v23 = vld [vmem:[%s214_s21] sm:$0x1] }
  0x5f   : > { %v237_v14 = vadd.f32 %v236_v13, %v233_v11  ;;  %p520_p1 = por %p519_p12, %p518_p10 }
  0x61   : > { %238 = vadd.xlane.f32.xlu0 %v237_v14  ;;  %p521_p2 = pnand %p520_p1, %p514_p4 }
  0xee   : > { %v239_v16 = vpop.xlane.xlu0 %238 }
  0xef   : > { %v240_v17 = vrot.slane %v239_v16, 4 }
  0xf1   : > { %v241_v18 = vadd.f32 %v240_v17, %v239_v16 }
  0xf3   : > { %v242_v19 = vrot.slane %v241_v18, 2 }
  0xf5   : > { %v243_v20 = vadd.f32 %v242_v19, %v241_v18 }
  0xf7   : > { %v244_v21 = vrot.slane %v243_v20, 1 }
  0xf9   : > { %v245_v22 = vadd.f32 %v244_v21, %v243_v20 }
  0xfb   : > { %381 = vpush %v245_v22 }
 0x12c   : > { %s382_s7 = spop %381 }
 0x12d   : > { %s247_s30 = ssub.f32 0.0, %s382_s7 }
 0x12f   : > { %v248_v24 = vstv %s247_s30 }
 0x130   : > { %v249_v25 = vadd.f32 %v248_v24, %v234_v23 }
 0x132   : > { %250 = vst [vmem:[%s214_s21] sm:$0x1] %v249_v25 }
 0x133   : > { %524 = shalt.err (!%p521_p2)
}
 0x134   : > { %s525_s15 = scalar_lea.hbm %s790_s29, 16  ;;  %s529_s6 = scalar_lea.hbm %s841_s2, 32 }
 0x135   : > { %p526_p9 = scmp.ne.s32.totalorder %s790_s29, %s525_s15  ;;  %p530_p6 = scmp.lt.u32.totalorder %s790_s29, %s841_s2 }
 0x136   : > { %p531_p13 = scmp.lt.u32.totalorder %s529_s6, %s525_s15  ;;  %p533_p8 = scmp.lt.u32.totalorder %s525_s15, %s790_s29 }
 0x137   : > { %p527_p11 = pnand %p526_p9, %p854_p0 }
 0x138   : > { %p532_p5 = por %p531_p13, %p530_p6 }
 0x139   : > { %p528_p3 = pneg %p527_p11 }
 0x13a   : > { %p534_p7 = por %p533_p8, %p532_p5 }
 0x13c   : > { %p535_p4 = pnand %p534_p7, %p528_p3 }
 0x13e   : > { %538 = shalt.err (!%p535_p4)
}
 0x13f   : > { %387 = dma.vmem_to_hbm [thread:$0]  (%p854_p0), %s792_s20, 16, %s790_s29, %s252_s25  }
 0x140 PF: > { %s276_s21 = sand.u32 1, %s577_s9   ;;  %p855_p10 = scmp.ne.s32.totalorder %s847_s24, 0 }
 0x141   : > { %p856_p12 = scmp.ge.s32.totalorder %s597_s14, 2  ;;  %s277_s7 = scalar_lea.sflag [#allocation4], %s276_s21 }
 0x143   : > { %p397_p1 = pnand %p856_p12, %p855_p10 }
 0x145   : > { %572 = dma.done.wait (!%p397_p1), %s277_s7, 16  }
 0x146   : > { %574 = vsyncadd (!%p397_p1), %s277_s7, 4294967280  ;;  %s21_s14 = sadd.s32 1, %s597_s14   ;;  %s857_s9 = smov %s581_s10 }
 0x147   : > { %p18_p2 = scmp.ge.s32.totalorder %s21_s14, 4   ;;  %s858_s10 = smov %s585_s11 }
 0x148   : > { %s859_s11 = smov %s674_s23  ;;  %s860_s12 = smov %s593_s13 }
 0x149   : > { %s861_s13 = smov %s863_s17  ;;  %20 = sbr.rel (!%p18_p2) target bundleno = 8 (0x8), region = 90 }
 0x150   :  { %281 = vsyncpa [#allocation3], 1 }
 0x151   :  { %283 = vsyncpa [#allocation3 + $0x1], 1 }
 0x152   :  { %284 = vsyncpa [#allocation6], 1 }
 0x153   :  { %286 = vsyncpa [#allocation6 + $0x1], 1 }
 0x154   :  { %287 = vsyncpa [#allocation4], 1 }
 0x155   :  { %289 = vsyncpa [#allocation4 + $0x1], 1 }

</bundles_post_ra>
